<compile_context>
chip_gen: v7x
topology: tpu7x:2x2x1
jax: 0.10.0
libtpu: 0.0.40
codegen_flags: <defaults>
</compile_context>

<pallas_src>
import functools

import jax
import jax.numpy as jnp
from jax.experimental import pallas as pl
from jax.experimental.pallas import tpu as pltpu


# ----------------------------------------------------------------------------
# Helpers
# ----------------------------------------------------------------------------
def _round_up(v, m):
    return ((v + m - 1) // m) * m


def _vmem_limit_bytes():
    """Per-generation VMEM budget: ~75% of physical, capped at 100 MiB."""
    cap = 64 * 1024 * 1024  # conservative fallback (v7x physical)
    try:
        info = pltpu.get_tpu_info()
        cap = int(getattr(info, "vmem_capacity_bytes", cap))
    except Exception:
        pass
    return min(cap * 3 // 4, 100 * 1024 * 1024)


def _derive_tile_n(N, dim, hid_dim, in_bytes, w_bytes, vmem_limit):
    """Largest MXU-aligned batch tile that fits the VMEM budget."""
    # Resident B/A; conservatively assume the pipeline gives them 2 buffers.
    # TODO(synk): verify via pl.lower_as_mlir whether constant-index-map B/A
    # really get a second pipeline buffer; if so pipeline_mode=pl.Buffered(1)
    # on those specs frees that VMEM for a larger tile_n / larger dim.
    weights = 2 * dim * hid_dim * w_bytes * 2
    per_row = (dim * in_bytes * 2     # x tile, double-buffered
               + dim * 4 * 2          # out tile (f32), double-buffered
               + hid_dim * 4          # relu(x@B) intermediate (f32)
               + dim * 4)             # out compute copy
    budget = vmem_limit - weights - (4 << 20)
    max_rows = budget // per_row if budget > 0 else 0
    if max_rows >= 512:
        t = min((max_rows // 256) * 256, 2048)
    elif max_rows >= 256:
        t = 256
    elif max_rows >= 128:
        t = 128
    else:
        # TODO(synk): for very large dim on v7x, add a second grid axis tiling
        # hid_dim with accumulation instead of shrinking the batch tile.
        t = max((max_rows // 8) * 8, 8)
    return min(t, _round_up(N, 8))


def _lane_dense_plan(total, elem_bytes, vmem_limit):
    """Pick a (rows, C) slab (C = big multiple of 128) and row tile for pass 2."""
    budget = max(vmem_limit - (4 << 20), 1 << 20)
    for C in (4096, 2048, 1024, 512, 256, 128):
        if total % C:
            continue
        rows = total // C
        per_row = C * elem_bytes * 6     # 3 arrays, double-buffered (upper bound)
        max_rows = max(1, budget // per_row)
        if rows <= max_rows:
            return (rows, C), rows, 1
        cand = (max_rows // 8) * 8
        while cand >= 8:
            if rows % cand == 0:
                return (rows, C), cand, rows // cand
            cand -= 8
    return None


# ----------------------------------------------------------------------------
# Fused single-call kernel (everything resident in VMEM)
# ----------------------------------------------------------------------------
def _fused_kernel(x_ref, b_ref, a_ref, y_ref, *, n_total, compute_dtype):
    x = x_ref[...]
    xc = x.astype(compute_dtype) if x.dtype != compute_dtype else x
    hid = jnp.maximum(
        jnp.dot(xc, b_ref[...], preferred_element_type=jnp.float32), 0.0)
    out = jnp.dot(hid.astype(compute_dtype), a_ref[...],
                  preferred_element_type=jnp.float32)
    # Two-pass (mean-shifted) unbiased variance: numerically safe and cheap
    # since `out` is fully resident.
    mean = jnp.mean(out, axis=0, keepdims=True)
    d = out - mean
    var = jnp.sum(d * d, axis=0, keepdims=True) * (1.0 / (n_total - 1))
    inv = jax.lax.rsqrt(jnp.max(var))          # max(std) == sqrt(max(var))
    y_ref[...] = (x.astype(jnp.float32) + out * inv).astype(y_ref.dtype)


# ----------------------------------------------------------------------------
# Tiled pass 1: matmuls + per-tile partial column sum / sumsq (parallel grid)
# ----------------------------------------------------------------------------
def _stats_kernel(x_ref, b_ref, a_ref, out_ref, psum_ref, psq_ref, *,
                  compute_dtype):
    x = x_ref[...]
    if x.dtype != compute_dtype:
        x = x.astype(compute_dtype)
    hid = jnp.maximum(
        jnp.dot(x, b_ref[...], preferred_element_type=jnp.float32), 0.0)
    out = jnp.dot(hid.astype(compute_dtype), a_ref[...],
                  preferred_element_type=jnp.float32)       # [tile_n, dim] f32
    out_ref[...] = out

    s = jnp.sum(out, axis=0, keepdims=True)                  # [1, dim]
    sq = jnp.sum(out * out, axis=0, keepdims=True)           # [1, dim]
    # Replicate across the 8 sublanes so the output block stays (8, dim)-shaped
    # (valid layout for any dim); the wrapper reads row 0 of each tile.
    psum_ref[...] = jnp.broadcast_to(s[None], psum_ref.shape)
    psq_ref[...] = jnp.broadcast_to(sq[None], psq_ref.shape)


# ----------------------------------------------------------------------------
# Tiled pass 2: y = x + out * inv   (inv is one scalar, read from SMEM)
# ----------------------------------------------------------------------------
def _apply_kernel(inv_ref, x_ref, out_ref, y_ref):
    inv = inv_ref[0, 0]
    y_ref[...] = (x_ref[...].astype(jnp.float32)
                  + out_ref[...] * inv).astype(y_ref.dtype)


# ----------------------------------------------------------------------------
# Wrapper
# ----------------------------------------------------------------------------
def spectral_norm_block_forward(x, B, A, num_blocks=None, *, tile_n=None,
                                use_bf16=True, fuse=None):
    # The reference PyTorch forward accepts num_blocks but never uses it.
    del num_blocks
    N, dim = x.shape
    hid_dim = B.shape[1]
    assert B.shape == (dim, hid_dim) and A.shape == (hid_dim, dim)
    assert N >= 2, "unbiased std (ddof=1) requires batch >= 2"

    compute_dtype = jnp.bfloat16 if use_bf16 else jnp.float32
    w_bytes = jnp.dtype(compute_dtype).itemsize
    f32b = jnp.dtype(jnp.float32).itemsize
    vmem_limit = _vmem_limit_bytes()

    # Cast the weights ONCE in the wrapper (not per grid step inside the
    # kernel): halves weight DMA + resident VMEM when use_bf16.
    Bc = B.astype(compute_dtype)
    Ac = A.astype(compute_dtype)

    # ------------------------- fused single-call path -----------------------
    fused_bytes = (3 * N * dim * f32b + N * hid_dim * f32b
                   + (N * dim * 2 if use_bf16 else 0)
                   + 2 * dim * hid_dim * w_bytes)
    if fuse is None:
        fuse = fused_bytes <= max(vmem_limit // 2, 8 << 20)
    if fuse:
        return pl.pallas_call(
            functools.partial(_fused_kernel, n_total=N,
                              compute_dtype=compute_dtype),
            out_shape=jax.ShapeDtypeStruct((N, dim), x.dtype),
            compiler_params=pltpu.CompilerParams(vmem_limit_bytes=vmem_limit),
            cost_estimate=pl.CostEstimate(
                flops=4 * N * dim * hid_dim + 4 * N * dim,
                transcendentals=1,
                bytes_accessed=2 * N * dim * f32b + 2 * dim * hid_dim * w_bytes),
        )(x, Bc, Ac)

    # ------------------------------ tiled path ------------------------------
    in_bytes = w_bytes if use_bf16 else jnp.dtype(x.dtype).itemsize
    if tile_n is None:
        tile_n = _derive_tile_n(N, dim, hid_dim, in_bytes, w_bytes, vmem_limit)
    tile_n = _round_up(int(tile_n), 8)
    N_pad = _round_up(N, tile_n)
    num_tiles = N_pad // tile_n

    # Zero-pad the batch: padded rows give out == 0 exactly, so they contribute
    # nothing to the column sums / sumsq (true N is used in the variance).
    x_pad = x if N_pad == N else jnp.pad(x, ((0, N_pad - N), (0, 0)))
    x_mm = x_pad.astype(compute_dtype)          # matmul operand (wrapper cast)

    out, p_sum, p_sq = pl.pallas_call(
        functools.partial(_stats_kernel, compute_dtype=compute_dtype),
        grid=(num_tiles,),
        in_specs=[
            pl.BlockSpec((tile_n, dim), lambda i: (i, 0)),      # x tile
            pl.BlockSpec((dim, hid_dim), lambda i: (0, 0)),     # B (VMEM-resident)
            pl.BlockSpec((hid_dim, dim), lambda i: (0, 0)),     # A (VMEM-resident)
        ],
        out_specs=(
            pl.BlockSpec((tile_n, dim), lambda i: (i, 0)),      # out tile
            pl.BlockSpec((1, 8, dim), lambda i: (i, 0, 0)),     # partial sums
            pl.BlockSpec((1, 8, dim), lambda i: (i, 0, 0)),     # partial sumsq
        ),
        out_shape=(
            jax.ShapeDtypeStruct((N_pad, dim), jnp.float32),
            jax.ShapeDtypeStruct((num_tiles, 8, dim), jnp.float32),
            jax.ShapeDtypeStruct((num_tiles, 8, dim), jnp.float32),
        ),
        compiler_params=pltpu.CompilerParams(
            dimension_semantics=("parallel",),       # megacore-shardable (v7x)
            vmem_limit_bytes=vmem_limit),
        cost_estimate=pl.CostEstimate(
            flops=4 * N_pad * dim * hid_dim,
            transcendentals=0,
            bytes_accessed=(N_pad * dim * (in_bytes + f32b)
                            + 2 * dim * hid_dim * w_bytes
                            + 2 * num_tiles * 8 * dim * f32b)),
    )(x_mm, Bc, Ac)

    # Finalize inv = rsqrt(max unbiased variance) — a few tiny plain-JAX ops.
    # TODO(synk): one-pass (sumsq - sum^2/n) variance can lose accuracy when
    # column means dominate the spread; switch to a shifted/Welford scheme if
    # that regime matters.
    s = p_sum[:, 0, :].sum(axis=0)
    sq = p_sq[:, 0, :].sum(axis=0)
    var = (sq - s * s / N) / (N - 1)
    var = jnp.maximum(var, 0.0)
    inv = jax.lax.rsqrt(jnp.max(var)).reshape(1, 1).astype(jnp.float32)

    # ---- pass 2: y = x + out * inv, lane-dense elementwise slab ----
    total = N_pad * dim
    plan = _lane_dense_plan(total, max(f32b, jnp.dtype(x.dtype).itemsize),
                            vmem_limit)
    if plan is not None:
        (rows, lanes), tile_r, grid2 = plan
        x2 = x_pad.reshape(rows, lanes)
        out2 = out.reshape(rows, lanes)
        slab = (rows, lanes)
    else:
        x2, out2 = x_pad, out
        slab = (N_pad, dim)
        tile_r, grid2 = tile_n, num_tiles

    # In-place writeback of `out` when dtypes allow (avoids a second HBM buffer).
    alias = {2: 0} if x.dtype == jnp.float32 else {}
    y = pl.pallas_call(
        _apply_kernel,
        grid=(grid2,),
        in_specs=[
            pl.BlockSpec(memory_space=pltpu.MemorySpace.SMEM),   # inv scalar
            pl.BlockSpec((tile_r, slab[1]), lambda i: (i, 0)),   # x slab tile
            pl.BlockSpec((tile_r, slab[1]), lambda i: (i, 0)),   # out slab tile
        ],
        out_specs=pl.BlockSpec((tile_r, slab[1]), lambda i: (i, 0)),
        out_shape=jax.ShapeDtypeStruct(slab, x.dtype),
        input_output_aliases=alias,
        compiler_params=pltpu.CompilerParams(
            dimension_semantics=("parallel",),
            vmem_limit_bytes=vmem_limit),
        cost_estimate=pl.CostEstimate(
            flops=2 * total,
            transcendentals=0,
            bytes_accessed=total * (2 * f32b + jnp.dtype(x.dtype).itemsize)),
    )(inv, x2, out2)

    y = y.reshape(N_pad, dim)
    return y[:N] if N_pad != N else y


# ----------------------------------------------------------------------------
# Deterministic parameter construction mirroring the PyTorch __init__:
# random matrix -> SVD -> replace singular values with sorted (descending)
# uniform draws -> reconstruct.  (Plain JAX, outside the kernel.)
# ----------------------------------------------------------------------------
def _make_spectral_matrix(key, shape, lo, hi):
    k1, k2 = jax.random.split(key)
    M = jax.random.normal(k1, shape, dtype=jnp.float32)
    U, S, Vh = jnp.linalg.svd(M, full_matrices=False)
    S_new = jax.random.uniform(k2, S.shape, dtype=jnp.float32) * (hi - lo) + lo
    S_new = jnp.sort(S_new)[::-1]                      # descending
    return (U * S_new[None, :]) @ Vh                   # U @ diag(S_new) @ Vh


def init_spectral_norm_block_params(key, dim):
    hid_dim = 4 * dim
    kb, ka = jax.random.split(key)
    B = _make_spectral_matrix(kb, (dim, hid_dim), 0.5, 1.0)
    A = _make_spectral_matrix(ka, (hid_dim, dim), 0.75, 1.0)
    return B, A


# ----------------------------------------------------------------------------
# Pure-JAX reference
# ----------------------------------------------------------------------------
def reference_forward(x, B, A):
    out = jnp.maximum(x @ B, 0.0) @ A
    std = jnp.std(out, axis=0, keepdims=True, ddof=1)
    return x + out / jnp.max(std)


if __name__ == "__main__":
    key = jax.random.PRNGKey(0)
    k_param, k_x, k_x2 = jax.random.split(key, 3)

    dim = 32                              # hid_dim = 128
    B, A = init_spectral_norm_block_params(k_param, dim)

    # --- Test 1: fused single-call path, f32 MXU operands (tight check) ---
    x = jax.random.normal(k_x, (64, dim), dtype=jnp.float32)
    fwd_f32 = jax.jit(functools.partial(
        spectral_norm_block_forward, num_blocks=3, use_bf16=False))
    y = jax.block_until_ready(fwd_f32(x, B, A))
    y_ref = reference_forward(x, B, A)
    assert y.shape == (64, dim)
    assert jnp.allclose(y, y_ref, atol=2e-4, rtol=2e-4), "fused f32 mismatch"

    # --- Test 2: fused path, bf16 MXU operands (default; looser tolerance) ---
    fwd_bf16 = jax.jit(functools.partial(spectral_norm_block_forward,
                                         num_blocks=3))
    y_b = jax.block_until_ready(fwd_bf16(x, B, A))
    assert jnp.allclose(y_b, y_ref, atol=6e-2, rtol=6e-2), "fused bf16 mismatch"

    # --- Test 3: tiled two-pass path (forced), padded batch (72 -> 96), f32 ---
    x2 = jax.random.normal(k_x2, (72, dim), dtype=jnp.float32)
    fwd_tiled = jax.jit(functools.partial(
        spectral_norm_block_forward, num_blocks=3, tile_n=32,
        use_bf16=False, fuse=False))
    y2 = jax.block_until_ready(fwd_tiled(x2, B, A))
    y2_ref = reference_forward(x2, B, A)
    assert y2.shape == (72, dim)
    assert jnp.allclose(y2, y2_ref, atol=2e-4, rtol=2e-4), "tiled f32 mismatch"

    print("KERNEL_OK")
</pallas_src>

<mosaic_0001>
module attributes {stable_mosaic.version = 11 : i64} {
  func.func @_fused_kernel(%arg0: memref<64x32xf32, #tpu.memory_space<vmem>>, %arg1: memref<32x128xf32, #tpu.memory_space<vmem>>, %arg2: memref<128x32xf32, #tpu.memory_space<vmem>>, %arg3: memref<64x32xf32, #tpu.memory_space<vmem>>) attributes {dimension_semantics = [], scalar_prefetch = 0 : i64, scratch_operands = 0 : i64, tpu.core_type = #tpu.core_type<tc>} {
    %c0 = arith.constant 0 : index
    %c0_0 = arith.constant 0 : index
    %0 = vector.load %arg0[%c0, %c0_0] : memref<64x32xf32, #tpu.memory_space<vmem>>, vector<64x32xf32>
    %c0_1 = arith.constant 0 : index
    %c0_2 = arith.constant 0 : index
    %1 = vector.load %arg1[%c0_1, %c0_2] : memref<32x128xf32, #tpu.memory_space<vmem>>, vector<32x128xf32>
    %cst = arith.constant dense<0.000000e+00> : vector<64x128xf32>
    %2 = tpu.matmul %0, %1, %cst {dimension_numbers = #tpu.dot_dimension_numbers<[1], [0], [0], [1], [0, 0, 1, 1], [], []>} : vector<64x32xf32>, vector<32x128xf32>, vector<64x128xf32> -> vector<64x128xf32>
    %cst_3 = arith.constant 0.000000e+00 : f32
    %3 = vector.broadcast %cst_3 : f32 to vector<64x128xf32>
    %4 = arith.maximumf %2, %3 : vector<64x128xf32>
    %c0_4 = arith.constant 0 : index
    %c0_5 = arith.constant 0 : index
    %5 = vector.load %arg2[%c0_4, %c0_5] : memref<128x32xf32, #tpu.memory_space<vmem>>, vector<128x32xf32>
    %cst_6 = arith.constant dense<0.000000e+00> : vector<64x32xf32>
    %6 = tpu.matmul %4, %5, %cst_6 {dimension_numbers = #tpu.dot_dimension_numbers<[1], [0], [0], [1], [0, 0, 1, 1], [], []>} : vector<64x128xf32>, vector<128x32xf32>, vector<64x32xf32> -> vector<64x32xf32>
    %cst_7 = arith.constant dense<0.000000e+00> : vector<32xf32>
    %7 = vector.multi_reduction <add>, %6, %cst_7 [0] : vector<64x32xf32> to vector<32xf32>
    %8 = vector.shape_cast %7 : vector<32xf32> to vector<1x32xf32>
    %cst_8 = arith.constant 6.400000e+01 : f32
    %9 = vector.broadcast %cst_8 : f32 to vector<1x32xf32>
    %10 = arith.divf %8, %9 : vector<1x32xf32>
    %11 = vector.broadcast %10 : vector<1x32xf32> to vector<64x32xf32>
    %12 = arith.subf %6, %11 : vector<64x32xf32>
    %13 = arith.mulf %12, %12 : vector<64x32xf32>
    %cst_9 = arith.constant dense<0.000000e+00> : vector<32xf32>
    %14 = vector.multi_reduction <add>, %13, %cst_9 [0] : vector<64x32xf32> to vector<32xf32>
    %15 = vector.shape_cast %14 : vector<32xf32> to vector<1x32xf32>
    %cst_10 = arith.constant 0.0158730168 : f32
    %16 = vector.broadcast %cst_10 : f32 to vector<1x32xf32>
    %17 = arith.mulf %15, %16 : vector<1x32xf32>
    %18 = vector.shape_cast %17 : vector<1x32xf32> to vector<1x1x32xf32>
    %cst_11 = arith.constant dense<0xFF800000> : vector<1xf32>
    %19 = vector.multi_reduction <maximumf>, %18, %cst_11 [1, 2] : vector<1x1x32xf32> to vector<1xf32>
    %20 = vector.shape_cast %19 : vector<1xf32> to vector<1x1x1xf32>
    %21 = vector.extract %20[0, 0, 0] : f32 from vector<1x1x1xf32>
    %22 = math.rsqrt %21 : f32
    %23 = vector.broadcast %22 : f32 to vector<64x32xf32>
    %24 = arith.mulf %6, %23 : vector<64x32xf32>
    %25 = arith.addf %0, %24 : vector<64x32xf32>
    %c0_12 = arith.constant 0 : index
    %c0_13 = arith.constant 0 : index
    %26 = vector.load %arg3[%c0_12, %c0_13] : memref<64x32xf32, #tpu.memory_space<vmem>>, vector<64x32xf32>
    tpu.vector_store %arg3[%c0_12, %c0_13], %25 {strides = array<i32>} : memref<64x32xf32, #tpu.memory_space<vmem>>, vector<64x32xf32>,
    return
  }
}

</mosaic_0001>

<bundles_post_ra>
// kernel: spectral_norm_block_forward.1
= control target key start
LH: loop header
LB: loop body
LE: loop exit
PB: predicated region body
PF: predicated region fallthrough
CT: control target
= control target key end

     0   :  { %vm26_vm0 = vcmask 261120   ;;  %s785_s1 = inlined_call_operand.vmem [shape: f32[32,128], index: 1, kind: input, shape index: {}]   ;;  %s786_s0 = inlined_call_operand.vmem [shape: f32[64,32], index: 0, kind: input, shape index: {}]   ;;  %s787_s2 = inlined_call_operand.vmem [shape: f32[128,32], index: 2, kind: input, shape index: {}]   ;;  %s788_s3 = inlined_call_operand.vmem [shape: f32[64,32], index: 3, kind: output, shape index: {}]  }
   0x1   :  { %v22_v0 = vld [vmem:[%s785_s1] sm:$0xff]  ;;  %v23_v1 = vld [vmem:[%s785_s1 + $0x8] sm:$0xff]  ;;  %v24_v2 = vld [vmem:[%s785_s1 + $0x10] sm:$0xff] }
   0x2   :  { %v490_v3 = vpack.c.bf16 %v23_v1, %v22_v0  ;;  %v25_v4 = vld [vmem:[%s785_s1 + $0x18] sm:$0xff]  ;;  %v587_v5 = vld [vmem:[%s786_s0] sm:$0xff]  ;;  %v165_v8 = vld [vmem:[%s787_s2 + $0x8] sm:$0xff] }
   0x3   :  { %v494_v6 = vpack.c.bf16 %v25_v4, %v24_v2  ;;  %434 = vmatprep.mubr.msk.f32.mxu0 %vm26_vm0, %v587_v5  ;;  %v164_v7 = vld [vmem:[%s787_s2] sm:$0xff]  ;;  %v166_v9 = vld [vmem:[%s787_s2 + $0x10] sm:$0xff]  ;;  %v167_v11 = vld [vmem:[%s787_s2 + $0x18] sm:$0xff] }
   0x4   :  { %491 = vmatprep.subr.bf16.mxu0 %v490_v3  ;;  %v498_v10 = vpack.c.bf16 %v165_v8, %v164_v7  ;;  %v502_v12 = vpack.c.bf16 %v167_v11, %v166_v9  ;;  %v606_v13 = vld [vmem:[%s786_s0 + $0x8] sm:$0xff]  ;;  %v611_v14 = vld [vmem:[%s786_s0 + $0x10] sm:$0xff]  ;;  %v168_v15 = vld [vmem:[%s787_s2 + $0x20] sm:$0xff] }
   0x5   :  { %493 = vmatpush3.bf16.msra.mxu0 %v490_v3  ;;  %v169_v16 = vld [vmem:[%s787_s2 + $0x28] sm:$0xff]  ;;  %v626_v17 = vld [vmem:[%s786_s0 + $0x18] sm:$0xff]  ;;  %v631_v19 = vld [vmem:[%s786_s0 + $0x20] sm:$0xff] }
   0x6   :  { %495 = vmatprep.subr.bf16.mxu0 %v494_v6  ;;  %530 = vmatprep.subr.bf16.mxu1 %v498_v10  ;;  %v506_v18 = vpack.c.bf16 %v169_v16, %v168_v15  ;;  %v170_v20 = vld [vmem:[%s787_s2 + $0x30] sm:$0xff]  ;;  %v171_v21 = vld [vmem:[%s787_s2 + $0x38] sm:$0xff]  ;;  %v646_v22 = vld [vmem:[%s786_s0 + $0x28] sm:$0xff] }
   0x7   :  { %538 = vmatpush3.bf16.msra.mxu1 %v498_v10  ;;  %v510_v23 = vpack.c.bf16 %v171_v21, %v170_v20  ;;  %v651_v24 = vld [vmem:[%s786_s0 + $0x30] sm:$0xff]  ;;  %v172_v25 = vld [vmem:[%s787_s2 + $0x40] sm:$0xff]  ;;  %v173_v26 = vld [vmem:[%s787_s2 + $0x48] sm:$0xff] }
   0x8   :  { %531 = vmatprep.subr.bf16.mxu1 %v502_v12  ;;  %v666_v27 = vld [vmem:[%s786_s0 + $0x38] sm:$0xff]  ;;  %v514_v28 = vpack.c.bf16 %v173_v26, %v172_v25  ;;  %v174_v29 = vld [vmem:[%s787_s2 + $0x50] sm:$0xff]  ;;  %v176_v32 = vld [vmem:[%s787_s2 + $0x60] sm:$0xff] }
   0x9   :  { %497 = vmatpush3.bf16.msra.mxu0 %v494_v6  ;;  %v175_v30 = vld [vmem:[%s787_s2 + $0x58] sm:$0xff]  ;;  %v177_v33 = vld [vmem:[%s787_s2 + $0x68] sm:$0xff]  ;;  %v178_v35 = vld [vmem:[%s787_s2 + $0x70] sm:$0xff] }
   0xa   :  { %499 = vmatprep.subr.bf16.mxu0 %v498_v10  ;;  %v518_v31 = vpack.c.bf16 %v175_v30, %v174_v29  ;;  %v522_v34 = vpack.c.bf16 %v177_v33, %v176_v32  ;;  %v179_v36 = vld [vmem:[%s787_s2 + $0x78] sm:$0xff] }
   0xb   :  { %539 = vmatpush3.bf16.msra.mxu1 %v502_v12  ;;  %v526_v37 = vpack.c.bf16 %v179_v36, %v178_v35 }
   0xc   :  { %435 = vmatmul.mubr.msk.f32.vlgmr.msra.gmra.mrb[0].mxu0 %vm26_vm0, %v606_v13  ;;  %532 = vmatprep.subr.bf16.mxu1 %v506_v18 }
   0xd   :  { %437 = vmatprep.mubr.msk.f32.mxu0 %vm26_vm0, %v611_v14  ;;  %501 = vmatpush3.bf16.msra.mxu0 %v498_v10 }
   0xe   :  { %503 = vmatprep.subr.bf16.mxu0 %v502_v12 }
   0xf   :  { %540 = vmatpush3.bf16.msra.mxu1 %v506_v18 }
  0x10   :  { %438 = vmatmul.mubr.msk.f32.gmra.mrb[2].mxu0 %vm26_vm0, %v626_v17  ;;  %533 = vmatprep.subr.bf16.mxu1 %v510_v23 }
  0x11   :  { %440 = vmatprep.mubr.msk.f32.mxu0 %vm26_vm0, %v631_v19  ;;  %505 = vmatpush3.bf16.msra.mxu0 %v502_v12 }
  0x12   :  { %507 = vmatprep.subr.bf16.mxu0 %v506_v18 }
  0x13   :  { %541 = vmatpush3.bf16.msra.mxu1 %v510_v23 }
  0x14   :  { %441 = vmatmul.mubr.msk.f32.gmra.mrb[4].mxu0 %vm26_vm0, %v646_v22  ;;  %534 = vmatprep.subr.bf16.mxu1 %v514_v28 }
  0x15   :  { %443 = vmatprep.mubr.msk.f32.mxu0 %vm26_vm0, %v651_v24  ;;  %509 = vmatpush3.bf16.msra.mxu0 %v506_v18 }
  0x16   :  { %511 = vmatprep.subr.bf16.mxu0 %v510_v23 }
  0x17   :  { %542 = vmatpush3.bf16.msra.mxu1 %v514_v28 }
  0x18   :  { %444 = vmatmul.mubr.msk.f32.gmra.mrb[6].mxu0 %vm26_vm0, %v666_v27  ;;  %535 = vmatprep.subr.bf16.mxu1 %v518_v31 }
  0x19   :  { %513 = vmatpush3.bf16.msra.mxu0 %v510_v23 }
  0x1a   :  { %515 = vmatprep.subr.bf16.mxu0 %v514_v28 }
  0x1b   :  { %543 = vmatpush3.bf16.msra.mxu1 %v518_v31 }
  0x1c   :  { %536 = vmatprep.subr.bf16.mxu1 %v522_v34 }
  0x1d   :  { %517 = vmatpush3.bf16.msra.mxu0 %v514_v28 }
  0x1e   :  { %519 = vmatprep.subr.bf16.mxu0 %v518_v31 }
  0x1f   :  { %544 = vmatpush3.bf16.msra.mxu1 %v522_v34 }
  0x20   :  { %537 = vmatprep.subr.bf16.mxu1 %v526_v37 }
  0x21   :  { %521 = vmatpush3.bf16.msra.mxu0 %v518_v31 }
  0x22   :  { %523 = vmatprep.subr.bf16.mxu0 %v522_v34 }
  0x23   :  { %545 = vmatpush3.bf16.msra.mxu1 %v526_v37 }
  0x25   :  { %525 = vmatpush3.bf16.msra.mxu0 %v522_v34 }
  0x26   :  { %527 = vmatprep.subr.bf16.mxu0 %v526_v37 }
  0x29   :  { %529 = vmatpush3.bf16.msra.mxu0 %v526_v37 }
  0xdf   :  { %v436_v38 = vpop.f32.mrb[0].mxu0 }
  0xe0   :  { %v117_v39 = vpop.f32.mrb[1].mxu0  ;;  %v157_v41 = vmax.f32 %v436_v38, 0.0 }
  0xe1   :  { %v156_v40 = vmax.f32 %v117_v39, 0.0 }
  0xe3   :  { %v439_v42 = vpop.f32.mrb[2].mxu0  ;;  %478 = vmatprep.mubr.f32.mxu0 %v156_v40 }
  0xe4   :  { %v127_v43 = vpop.f32.mrb[3].mxu0  ;;  %479 = vmatmul.mubr.f32.vlgmr.msra.gmra.mrb[8].mxu0 %v157_v41  ;;  %v159_v45 = vmax.f32 %v439_v42, 0.0 }
  0xe5   :  { %v158_v44 = vmax.f32 %v127_v43, 0.0 }
  0xe7   :  { %v442_v46 = vpop.f32.mrb[4].mxu0  ;;  %481 = vmatprep.mubr.f32.mxu1 %v158_v44 }
  0xe8   :  { %v137_v47 = vpop.f32.mrb[5].mxu0  ;;  %482 = vmatmul.mubr.f32.vlgmr.msra.gmra.mrb[0].mxu1 %v159_v45  ;;  %v161_v49 = vmax.f32 %v442_v46, 0.0 }
  0xe9   :  { %v160_v48 = vmax.f32 %v137_v47, 0.0 }
  0xeb   :  { %v445_v50 = vpop.f32.mrb[6].mxu0  ;;  %484 = vmatprep.mubr.f32.mxu1 %v160_v48 }
  0xec   :  { %v147_v51 = vpop.f32.mrb[7].mxu0  ;;  %485 = vmatmul.mubr.f32.gmra.mrb[2].mxu1 %v161_v49  ;;  %v163_v53 = vmax.f32 %v445_v50, 0.0 }
  0xed   :  { %v162_v52 = vmax.f32 %v147_v51, 0.0 }
  0xef   :  { %487 = vmatprep.mubr.f32.mxu1 %v162_v52 }
  0xf0   :  { %488 = vmatmul.mubr.f32.gmra.mrb[4].mxu1 %v163_v53 }
 0x1b7   :  { %v688_v54 = vpop.f32.mrb[8].mxu0 }
 0x1b8   :  { %v286_v55 = vsel %vm26_vm0, %v688_v54, 0.0  ;;  %v692_v56 = vpop.f32.mrb[9].mxu0 }
 0x1b9   :  { %v285_v57 = vsel %vm26_vm0, %v692_v56, 0.0 }
 0x1ba   :  { %v287_v58 = vadd.f32 %v286_v55, %v285_v57 }
 0x1bb   :  { %v696_v59 = vpop.f32.mrb[0].mxu1 }
 0x1bc   :  { %v698_v60 = vpop.f32.mrb[1].mxu1  ;;  %v290_v63 = vsel %vm26_vm0, %v696_v59, 0.0 }
 0x1bd   :  { %v288_v61 = vsel %vm26_vm0, %v698_v60, 0.0 }
 0x1be   :  { %v289_v62 = vadd.f32 %v288_v61, %v287_v58 }
 0x1bf   :  { %v704_v0 = vpop.f32.mrb[2].mxu1 }
 0x1c0   :  { %v706_v1 = vpop.f32.mrb[3].mxu1  ;;  %v291_v2 = vadd.f32 %v290_v63, %v289_v62  ;;  %v294_v6 = vsel %vm26_vm0, %v704_v0, 0.0 }
 0x1c1   :  { %v292_v3 = vsel %vm26_vm0, %v706_v1, 0.0 }
 0x1c2   :  { %v293_v4 = vadd.f32 %v292_v3, %v291_v2 }
 0x1c3   :  { %v712_v7 = vpop.f32.mrb[4].mxu1 }
 0x1c4   :  { %v714_v8 = vpop.f32.mrb[5].mxu1  ;;  %v295_v9 = vadd.f32 %v294_v6, %v293_v4  ;;  %v298_v12 = vsel %vm26_vm0, %v712_v7, 0.0 }
 0x1c5   :  { %v296_v10 = vsel %vm26_vm0, %v714_v8, 0.0 }
 0x1c6   :  { %v297_v11 = vadd.f32 %v296_v10, %v295_v9 }
 0x1c8   :  { %v299_v15 = vadd.f32 %v298_v12, %v297_v11 }
 0x1ca   :  { %v300_v16 = vrot.slane %v299_v15, 4 }
 0x1cc   :  { %v301_v18 = vadd.f32 %v300_v16, %v299_v15 }
 0x1ce   :  { %v302_v20 = vrot.slane %v301_v18, 2 }
 0x1d0   :  { %v303_v21 = vadd.f32 %v302_v20, %v301_v18 }
 0x1d2   :  { %v304_v23 = vrot.slane %v303_v21, 1 }
 0x1d4   :  { %v305_v25 = vadd.f32 %v304_v23, %v303_v21 }
 0x1d6   :  { %v307_v26 = vmul.f32 0.015625, %v305_v25 }
 0x1d8   :  { %v308_v28 = vsub.f32 %v692_v56, %v307_v26  ;;  %v309_v29 = vsub.f32 %v688_v54, %v307_v26  ;;  %v310_v30 = vsub.f32 %v698_v60, %v307_v26  ;;  %v311_v31 = vsub.f32 %v696_v59, %v307_v26 }
 0x1d9   :  { %v312_v32 = vsub.f32 %v706_v1, %v307_v26  ;;  %v313_v33 = vsub.f32 %v704_v0, %v307_v26  ;;  %v314_v34 = vsub.f32 %v714_v8, %v307_v26  ;;  %v315_v35 = vsub.f32 %v712_v7, %v307_v26 }
 0x1da   :  { %v316_v36 = vmul.f32 %v308_v28, %v308_v28  ;;  %v317_v37 = vmul.f32 %v309_v29, %v309_v29  ;;  %v318_v38 = vmul.f32 %v310_v30, %v310_v30  ;;  %v319_v39 = vmul.f32 %v311_v31, %v311_v31 }
 0x1db   :  { %v320_v43 = vmul.f32 %v312_v32, %v312_v32  ;;  %v321_v46 = vmul.f32 %v313_v33, %v313_v33  ;;  %v322_v49 = vmul.f32 %v314_v34, %v314_v34  ;;  %v323_v52 = vmul.f32 %v315_v35, %v315_v35 }
 0x1dc   :  { %v324_v40 = vsel %vm26_vm0, %v316_v36, 0.0  ;;  %v325_v41 = vsel %vm26_vm0, %v317_v37, 0.0  ;;  %v327_v44 = vsel %vm26_vm0, %v318_v38, 0.0  ;;  %v329_v47 = vsel %vm26_vm0, %v319_v39, 0.0 }
 0x1dd   :  { %v326_v42 = vadd.f32 %v325_v41, %v324_v40  ;;  %v331_v50 = vsel %vm26_vm0, %v320_v43, 0.0  ;;  %v333_v53 = vsel %vm26_vm0, %v321_v46, 0.0  ;;  %v335_v57 = vsel %vm26_vm0, %v322_v49, 0.0 }
 0x1de   :  { %v337_v61 = vsel %vm26_vm0, %v323_v52, 0.0 }
 0x1df   :  { %v328_v45 = vadd.f32 %v327_v44, %v326_v42 }
 0x1e1   :  { %v330_v48 = vadd.f32 %v329_v47, %v328_v45 }
 0x1e3   :  { %v332_v51 = vadd.f32 %v331_v50, %v330_v48 }
 0x1e5   :  { %v334_v55 = vadd.f32 %v333_v53, %v332_v51 }
 0x1e7   :  { %v336_v58 = vadd.f32 %v335_v57, %v334_v55 }
 0x1e9   :  { %v338_v62 = vadd.f32 %v337_v61, %v336_v58 }
 0x1eb   :  { %v339_v63 = vrot.slane %v338_v62, 4 }
 0x1ed   :  { %v340_v2 = vadd.f32 %v339_v63, %v338_v62 }
 0x1ef   :  { %v341_v3 = vrot.slane %v340_v2, 2 }
 0x1f1   :  { %v342_v4 = vadd.f32 %v341_v3, %v340_v2 }
 0x1f3   :  { %v343_v6 = vrot.slane %v342_v4, 1 }
 0x1f5   :  { %v344_v9 = vadd.f32 %v343_v6, %v342_v4 }
 0x1f7   :  { %v345_v10 = vmul.f32 0.015873017, %v344_v9 }
 0x1f9   :  { %v346_v11 = vsel %vm26_vm0, %v345_v10, -inf }
 0x1fa   :  { %347 = vmax.xlane.f32.xlu0 %v346_v11 }
 0x287   :  { %v348_v12 = vpop.xlane.xlu0 %347 }
 0x288   :  { %546 = vpush %v348_v12 }
 0x2b9   :  { %s547_s2 = spop %546 }
 0x2ba   :  { %v350_v15 = vstv %s547_s2 }
 0x2bb   :  { %550 = vrsqrt.f32 %v350_v15 }
 0x2c5   :  { %v551_v16 = vpop.eup %550 }
 0x2c6   :  { %548 = vpush %v551_v16 }
 0x2f7   :  { %s549_s11 = spop %548 }
 0x2f8   :  { %v353_v18 = vstv %s549_s11 }
 0x2f9   :  { %v354_v20 = vmul.f32 %v353_v18, %v692_v56  ;;  %v355_v21 = vmul.f32 %v688_v54, %v353_v18  ;;  %v356_v23 = vmul.f32 %v353_v18, %v698_v60  ;;  %v357_v25 = vmul.f32 %v696_v59, %v353_v18 }
 0x2fa   :  { %v358_v26 = vmul.f32 %v353_v18, %v706_v1  ;;  %v359_v28 = vmul.f32 %v704_v0, %v353_v18  ;;  %v360_v29 = vmul.f32 %v353_v18, %v714_v8  ;;  %v361_v30 = vmul.f32 %v712_v7, %v353_v18 }
 0x2fb   :  { %v362_v31 = vadd.f32 %v354_v20, %v587_v5  ;;  %v363_v32 = vadd.f32 %v355_v21, %v606_v13  ;;  %v364_v56 = vadd.f32 %v356_v23, %v611_v14  ;;  %v365_v54 = vadd.f32 %v357_v25, %v626_v17 }
 0x2fc   :  { %v366_v60 = vadd.f32 %v358_v26, %v631_v19  ;;  %v367_v59 = vadd.f32 %v359_v28, %v646_v22  ;;  %v368_v1 = vadd.f32 %v360_v29, %v651_v24  ;;  %v369_v0 = vadd.f32 %v361_v30, %v666_v27 }
 0x2fd   :  { %370 = vst.msk [vmem:[%s788_s3] sm:$0xff] %vm26_vm0, %v362_v31  ;;  %371 = vst.msk [vmem:[%s788_s3 + $0x8] sm:$0xff] %vm26_vm0, %v363_v32 }
 0x2fe   :  { %372 = vst.msk [vmem:[%s788_s3 + $0x10] sm:$0xff] %vm26_vm0, %v364_v56  ;;  %373 = vst.msk [vmem:[%s788_s3 + $0x18] sm:$0xff] %vm26_vm0, %v365_v54 }
 0x2ff   :  { %374 = vst.msk [vmem:[%s788_s3 + $0x20] sm:$0xff] %vm26_vm0, %v366_v60  ;;  %375 = vst.msk [vmem:[%s788_s3 + $0x28] sm:$0xff] %vm26_vm0, %v367_v59 }
 0x300   :  { %376 = vst.msk [vmem:[%s788_s3 + $0x30] sm:$0xff] %vm26_vm0, %v368_v1  ;;  %377 = vst.msk [vmem:[%s788_s3 + $0x38] sm:$0xff] %vm26_vm0, %v369_v0 }

</bundles_post_ra>
